<compile_context>
chip_gen: v5e
topology: v5e:2x2
jax: 0.10.0
libtpu: 0.0.40
codegen_flags: <defaults>
</compile_context>

<pallas_src>
import jax
import jax.numpy as jnp
from jax.experimental import pallas as pl
from jax.experimental.pallas import tpu as pltpu


def _log_softmax_kernel(x_ref, o_ref):
    """Row-wise (axis=1) numerically-stable log_softmax on a (tile_b, n_output) block."""
    x = x_ref[...]
    m = jnp.max(x, axis=-1, keepdims=True)          # XLU lane reduce
    shifted = x - m
    # No masking needed: the block's last dim is exactly n_output (no padded
    # columns), so the reduction only ever sees real logits.
    lse = jnp.log(jnp.sum(jnp.exp(shifted), axis=-1, keepdims=True))
    o_ref[...] = shifted - lse


def _round_up(x: int, m: int) -> int:
    return ((x + m - 1) // m) * m


def _pick_tile_b(batch: int, n_output: int) -> int:
    """Rows per block: ~2 MiB per buffer so double-buffered in+out (4 buffers)
    stays well under the scoped-VMEM default on v5e/v6e/v7x (v7x: 64 MiB)."""
    lanes = _round_up(max(n_output, 1), 128)         # physical lane padding in VMEM
    budget_rows = (2 * 1024 * 1024) // (4 * lanes)   # f32
    budget_rows = max(8, min(8192, (budget_rows // 8) * 8))
    if batch <= budget_rows:
        # Single block; block dim == full array dim is always legal, regardless
        # of the (8, 128) divisibility rule.
        return batch
    # Multiple of 8; a non-divisible tail block is handled by Pallas' OOB
    # masking (per-row softmax, so padding rows never contaminate valid rows).
    return budget_rows


def random_classifier_forward(x: jax.Array, key: jax.Array, n_output: int = 1) -> jax.Array:
    """Pallas implementation of RandomClassifier.forward.

    x: any array; only x.shape[0] (batch) is used, as in the PyTorch module.
    Returns f32[batch, n_output] log-probabilities.
    """
    batch = x.shape[0]

    # Degenerate default config: log_softmax over one class is exactly 0.
    if n_output == 1:
        return jnp.zeros((batch, 1), dtype=jnp.float32)

    # Uniform [0, 1) logits, matching torch.rand's range/distribution.
    logits = jax.random.uniform(key, (batch, n_output), dtype=jnp.float32)

    tile_b = _pick_tile_b(batch, n_output)
    grid = (pl.cdiv(batch, tile_b),)

    return pl.pallas_call(
        _log_softmax_kernel,
        out_shape=jax.ShapeDtypeStruct((batch, n_output), jnp.float32),
        grid=grid,
        in_specs=[pl.BlockSpec((tile_b, n_output), lambda i: (i, 0))],
        out_specs=pl.BlockSpec((tile_b, n_output), lambda i: (i, 0)),
        compiler_params=pltpu.CompilerParams(
            dimension_semantics=("parallel",)),
    )(logits)


if __name__ == "__main__":
    key = jax.random.PRNGKey(0)
    kx, klogits = jax.random.split(key)

    # Example input consistent with a classifier: small NCHW image batch.
    x = jax.random.normal(kx, (2, 4, 16, 16), dtype=jnp.float32)

    # Multi-class case exercises the Pallas log_softmax kernel.
    n_output = 10
    out = random_classifier_forward(x, klogits, n_output=n_output)
    out = jax.block_until_ready(out)

    assert out.shape == (2, n_output), out.shape
    assert out.dtype == jnp.float32

    # Reference: same uniform logits (same key) through jax.nn.log_softmax.
    ref_logits = jax.random.uniform(klogits, (2, n_output), dtype=jnp.float32)
    ref = jax.nn.log_softmax(ref_logits, axis=1)
    assert jnp.allclose(out, ref, atol=1e-5, rtol=1e-5), (out, ref)
    assert jnp.allclose(jnp.sum(jnp.exp(out), axis=1), 1.0, atol=1e-5)

    # Default n_output=1 path: short-circuits to exact zeros (log_softmax over
    # a single class) without launching the kernel.
    out1 = jax.block_until_ready(random_classifier_forward(x, klogits, n_output=1))
    assert out1.shape == (2, 1) and bool(jnp.all(out1 == 0.0))

    print("KERNEL_OK")
</pallas_src>

<mosaic_0001>
module attributes {stable_mosaic.version = 11 : i64} {
  func.func @_log_softmax_kernel(%arg0: i32, %arg1: memref<2x10xf32, #tpu.memory_space<vmem>>, %arg2: memref<2x10xf32, #tpu.memory_space<vmem>>) attributes {dimension_semantics = [#tpu.dimension_semantics<parallel>], iteration_bounds = array<i64: 1>, scalar_prefetch = 0 : i64, scratch_operands = 0 : i64, tpu.core_type = #tpu.core_type<tc>, window_params = [{transform_indices = @transform_0, window_bounds = array<i64: 2, 10>}, {transform_indices = @transform_1, window_bounds = array<i64: 2, 10>}]} {
    %c0 = arith.constant 0 : index
    %c0_0 = arith.constant 0 : index
    %0 = vector.load %arg1[%c0, %c0_0] : memref<2x10xf32, #tpu.memory_space<vmem>>, vector<2x10xf32>
    %cst = arith.constant dense<0xFF800000> : vector<2xf32>
    %1 = vector.multi_reduction <maximumf>, %0, %cst [1] : vector<2x10xf32> to vector<2xf32>
    %2 = vector.shape_cast %1 : vector<2xf32> to vector<2x1xf32>
    %3 = vector.broadcast %2 : vector<2x1xf32> to vector<2x10xf32>
    %4 = arith.subf %0, %3 : vector<2x10xf32>
    %5 = math.exp %4 : vector<2x10xf32>
    %cst_1 = arith.constant dense<0.000000e+00> : vector<2xf32>
    %6 = vector.multi_reduction <add>, %5, %cst_1 [1] : vector<2x10xf32> to vector<2xf32>
    %7 = vector.shape_cast %6 : vector<2xf32> to vector<2x1xf32>
    %8 = math.log %7 : vector<2x1xf32>
    %9 = vector.broadcast %8 : vector<2x1xf32> to vector<2x10xf32>
    %10 = arith.subf %4, %9 : vector<2x10xf32>
    %c0_2 = arith.constant 0 : index
    %c0_3 = arith.constant 0 : index
    %11 = vector.load %arg2[%c0_2, %c0_3] : memref<2x10xf32, #tpu.memory_space<vmem>>, vector<2x10xf32>
    tpu.vector_store %arg2[%c0_2, %c0_3], %10 {strides = array<i32>} : memref<2x10xf32, #tpu.memory_space<vmem>>, vector<2x10xf32>,
    return
  }
  func.func @transform_0(%arg0: i32) -> (i32, i32) {
    %c0_i32 = arith.constant 0 : i32
    %c0_i32_0 = arith.constant 0 : i32
    return %arg0, %c0_i32 : i32, i32
  }
  func.func @transform_1(%arg0: i32) -> (i32, i32) {
    %c0_i32 = arith.constant 0 : i32
    %c0_i32_0 = arith.constant 0 : i32
    return %arg0, %c0_i32 : i32, i32
  }
}

</mosaic_0001>

<bundles_post_ra>
// kernel: tpu_custom_call.1
= control target key start
LH: loop header
LB: loop body
LE: loop exit
PB: predicated region body
PF: predicated region fallthrough
CT: control target
= control target key end

     0   :  { %6 = vsyncpa [#allocation3], 0  ;;  %s134_s0 = inlined_call_operand.hbm [shape: f32[2,10], index: 0, kind: input, shape index: {}]   ;;  %s135_s1 = inlined_call_operand.hbm [shape: f32[2,10], index: 1, kind: output, shape index: {}]  }
   0x1   :  { %7 = vsyncpa [#allocation4], 0  ;;  %s13_s8 = sshll.u32 %s134_s0, 4  ;;  %s113_s9 = smov [#allocation2]   ;;  %s14_s8 = int_to_ptr.hbm [resolvable:$true] %s13_s8 }
   0x2   :  { %s15_s10 = sshll.u32 %s113_s9, 4  ;;  %s16_s10 = int_to_ptr.vmem [resolvable:$true] %s15_s10 }
   0x3   :  { %18 = dma.hbm_to_vmem [thread:$0]  %s14_s8, 32, %s16_s10, [#allocation3]  }
   0x4   :  { %109 = dma.done.wait [#allocation3], 32  }
   0x5   :  { %110 = vsyncadd [#allocation3], 4294967264  ;;  %vm24_vm0 = vcmask 74752   ;;  %v23_v0 = vld [vmem:[#allocation2] sm:$0x3]  ;;  %s114_s0 = smov [#allocation5]  }
   0x6   :  { %v25_v1 = vsel %vm24_vm0, %v23_v0, -inf  ;;  %s43_s11 = sshll.u32 %s114_s0, 4  ;;  %s45_s14 = sshll.u32 %s135_s1, 4  ;;  %s44_s11 = int_to_ptr.vmem [resolvable:$true] %s43_s11  ;;  %s46_s14 = int_to_ptr.hbm [resolvable:$true] %s45_s14 }
   0x7   :  { %26 = vmax.xlane.f32.xlu0 %v25_v1 }
  0x7a   :  { %v27_v2 = vpop.xlane.xlu0 %26 }
  0x7b   :  { %v28_v3 = vsub.f32 %v23_v0, %v27_v2 }
  0x7d   :  { %v29_v4 = vmul.f32 1.442695, %v28_v3 }
  0x7f   :  { %57 = vpow2.f32 %v29_v4 }
  0x85   :  { %v58_v5 = vpop.eup %57 }
  0x86   :  { %v31_v6 = vsel %vm24_vm0, %v58_v5, 0.0 }
  0x87   :  { %32 = vadd.xlane.f32.xlu0 %v31_v6 }
  0xfa   :  { %v33_v7 = vpop.xlane.xlu0 %32 }
  0xfb   :  { %59 = vlog2.f32 %v33_v7 }
 0x101   :  { %v60_v8 = vpop.eup %59 }
 0x102   :  { %v35_v9 = vmul.f32 0.6931472, %v60_v8 }
 0x104   :  { %v36_v10 = vsub.f32 %v28_v3, %v35_v9 }
 0x106   :  { %37 = vst.msk [vmem:[#allocation5] sm:$0x3] %vm24_vm0, %v36_v10 }
 0x107   :  { %48 = dma.vmem_to_hbm [thread:$0]  %s44_s11, 32, %s46_s14, [#allocation4]  }
 0x108   :  { %111 = dma.done.wait [#allocation4], 32  }
 0x109   :  { %112 = vsyncadd [#allocation4], 4294967264 }
 0x10a   :  { %53 = vsyncpa [#allocation3], 1 }
 0x10b   :  { %54 = vsyncpa [#allocation4], 1 }

</bundles_post_ra>
